<compile_context>
chip_gen: v7x
topology: tpu7x:2x2x1
jax: 0.10.0
libtpu: 0.0.40
codegen_flags: <defaults>
</compile_context>

<pallas_src>
import functools

import jax
import jax.numpy as jnp
from jax.experimental import pallas as pl
from jax.experimental.pallas import tpu as pltpu

INPUT_DIM = 5
H0, H1, H2 = 128, 256, 128
NUM_CLASSES = 2
OUT_PAD = 8                # padded output width (8 lanes; 16x fewer bytes than 128)


def _mlp_kernel(x_ref,
                w0_ref, b0_ref,
                w1_ref, b1_ref,
                w2_ref, b2_ref,
                w3_ref, b3_ref,
                o_ref):
    """Fused 4-layer MLP with ReLU between the first three layers.

    One grid step processes a (tile, 5) batch slab and writes a (tile, 8)
    output slab.  fc1/fc2/fc3 use bf16 operands with f32 accumulation; the
    bias-add / ReLU path stays f32 (v5e VPU has no bf16 support).
    """
    # fc0: K=5 is negligible MXU work, keep it f32.
    h = jnp.dot(x_ref[...], w0_ref[...],
                preferred_element_type=jnp.float32) + b0_ref[...]
    h = jnp.maximum(h, 0.0).astype(jnp.bfloat16)

    # fc1
    h = jnp.dot(h, w1_ref[...],
                preferred_element_type=jnp.float32) + b1_ref[...]
    h = jnp.maximum(h, 0.0).astype(jnp.bfloat16)

    # fc2
    h = jnp.dot(h, w2_ref[...],
                preferred_element_type=jnp.float32) + b2_ref[...]
    h = jnp.maximum(h, 0.0).astype(jnp.bfloat16)

    # dropout(p=0.5) is identity in eval / inference mode.
    # TODO(synk): training-mode dropout would use pltpu.prng_seed /
    # pltpu.prng_random_bits to build a 0.5 keep-mask.

    # fc3: N trimmed to OUT_PAD=8 (only 2 useful classes; no wasted columns).
    o_ref[...] = (jnp.dot(h, w3_ref[...],
                          preferred_element_type=jnp.float32) + b3_ref[...])


def _round_up(n, m):
    return ((n + m - 1) // m) * m


def _pick_tile(b8, batch_tile):
    """Largest multiple-of-8 divisor of b8 that is <= the tile cap.

    The cap enforces (a) the user batch_tile and (b) >= 2 grid steps whenever
    b8 allows it, so v7x's two TensorCores both get work on the "parallel"
    batch axis.  Picking a divisor of b8 means zero tail-padding waste beyond
    the round-up of B to a multiple of 8.
    """
    cap = min(max(batch_tile, 8), b8)
    if b8 >= 16:
        cap = min(cap, b8 // 2)
    n8 = b8 // 8
    best = 1
    d = 1
    while d * d <= n8:
        if n8 % d == 0:
            for c in (d, n8 // d):
                if c * 8 <= cap and c > best:
                    best = c
        d += 1
    return best * 8


@functools.partial(jax.jit, static_argnames=("batch_tile",))
def lenet_forward(x, params, *, batch_tile=1024):
    """x: (B, INPUT_DIM) float32, params from prepare_params()
    -> (B, NUM_CLASSES) float32."""
    w0, b0, w1, b1, w2, b2, w3, b3 = params
    B = x.shape[0]

    B8 = _round_up(B, 8)
    tile = _pick_tile(B8, batch_tile)
    if B8 != B:  # only pad the batch when strictly needed (B not multiple of 8)
        x = jnp.pad(x, ((0, B8 - B), (0, 0)))

    grid = (B8 // tile,)

    def x_map(i):
        return (i, 0)

    def full_map(i):
        return (0, 0)

    weights = (w0, b0, w1, b1, w2, b2, w3, b3)
    # Weights / biases are tiny (<300 KB): keep full tensors resident every
    # grid step (invariant index_map).  Only the batch axis is tiled/pipelined.
    weight_specs = [pl.BlockSpec(w.shape, full_map) for w in weights]

    out = pl.pallas_call(
        _mlp_kernel,
        out_shape=jax.ShapeDtypeStruct((B8, OUT_PAD), jnp.float32),
        grid_spec=pltpu.PrefetchScalarGridSpec(
            num_scalar_prefetch=0,
            grid=grid,
            # x passed unpadded in features: block last dim 5 == full array dim.
            in_specs=[pl.BlockSpec((tile, INPUT_DIM), x_map)] + weight_specs,
            out_specs=pl.BlockSpec((tile, OUT_PAD), x_map),
        ),
        compiler_params=pltpu.CompilerParams(
            dimension_semantics=("parallel",),
            vmem_limit_bytes=32 * 1024 * 1024),
    )(x, *weights)

    return out[:B, :NUM_CLASSES]


def init_params(key):
    """Deterministic init mimicking nn.Linear's U(-1/sqrt(fan_in), 1/sqrt(fan_in)).

    Weights are stored transposed relative to PyTorch: (in_features, out_features).
    Biases are stored as (1, out_features) so they broadcast cleanly in-kernel.
    """
    dims = [(INPUT_DIM, H0), (H0, H1), (H1, H2), (H2, NUM_CLASSES)]
    params = []
    keys = jax.random.split(key, 2 * len(dims))
    for li, (fan_in, fan_out) in enumerate(dims):
        bound = 1.0 / (fan_in ** 0.5)
        w = jax.random.uniform(keys[2 * li], (fan_in, fan_out),
                               minval=-bound, maxval=bound, dtype=jnp.float32)
        b = jax.random.uniform(keys[2 * li + 1], (1, fan_out),
                               minval=-bound, maxval=bound, dtype=jnp.float32)
        params += [w, b]
    return tuple(params)


def prepare_params(params):
    """One-time (outside-jit) conversion of f32 params into kernel-ready form.

    * fc1/fc2/fc3 weights cast to bf16 (MXU-native on v6e/v7x); biases stay f32.
    * fc3 weight/bias zero-padded 2 -> OUT_PAD(=8) columns.
    * fc0 stays f32 (K=5, negligible).
    Doing this once avoids per-call padding/cast passes over HBM.
    """
    w0, b0, w1, b1, w2, b2, w3, b3 = params
    w3_p = jnp.zeros((H2, OUT_PAD), jnp.float32).at[:, :NUM_CLASSES].set(w3)
    b3_p = jnp.zeros((1, OUT_PAD), jnp.float32).at[:, :NUM_CLASSES].set(b3)
    return (w0, b0,
            w1.astype(jnp.bfloat16), b1,
            w2.astype(jnp.bfloat16), b2,
            w3_p.astype(jnp.bfloat16), b3_p)


def reference_forward(x, params):
    """Pure-JAX f32 reference for a sanity check."""
    w0, b0, w1, b1, w2, b2, w3, b3 = params
    h = jnp.maximum(x @ w0 + b0, 0.0)
    h = jnp.maximum(h @ w1 + b1, 0.0)
    h = jnp.maximum(h @ w2 + b2, 0.0)
    return h @ w3 + b3


if __name__ == "__main__":
    key = jax.random.PRNGKey(0)
    k_x, k_p = jax.random.split(key)
    raw_params = init_params(k_p)
    params = prepare_params(raw_params)

    # B=8  : single grid step (tile = 8).
    # B=6  : batch zero-pad path (6 -> 8).
    # B=40 : multi-step grid (tile = 8, 5 steps) exercising the pipeline.
    # Tolerances are loose because fc1..fc3 run with bf16 operands.
    for B, seed in ((8, 0), (6, 1), (40, 2)):
        x = jax.random.normal(jax.random.PRNGKey(seed), (B, INPUT_DIM),
                              dtype=jnp.float32)
        out = jax.block_until_ready(lenet_forward(x, params))
        ref = reference_forward(x, raw_params)
        assert out.shape == (B, NUM_CLASSES), f"bad shape for B={B}: {out.shape}"
        assert jnp.allclose(out, ref, atol=5e-2, rtol=5e-2), \
            f"mismatch vs f32 reference (B={B})"

    print("KERNEL_OK")
</pallas_src>

<mosaic_0001>
module attributes {stable_mosaic.version = 11 : i64} {
  func.func @_mlp_kernel(%arg0: i32, %arg1: memref<8x5xf32, #tpu.memory_space<vmem>>, %arg2: memref<5x128xf32, #tpu.memory_space<vmem>>, %arg3: memref<1x128xf32, #tpu.memory_space<vmem>>, %arg4: memref<128x256xbf16, #tpu.memory_space<vmem>>, %arg5: memref<1x256xf32, #tpu.memory_space<vmem>>, %arg6: memref<256x128xbf16, #tpu.memory_space<vmem>>, %arg7: memref<1x128xf32, #tpu.memory_space<vmem>>, %arg8: memref<128x8xbf16, #tpu.memory_space<vmem>>, %arg9: memref<1x8xf32, #tpu.memory_space<vmem>>, %arg10: memref<8x8xf32, #tpu.memory_space<vmem>>) attributes {dimension_semantics = [#tpu.dimension_semantics<parallel>], iteration_bounds = array<i64: 1>, scalar_prefetch = 0 : i64, scratch_operands = 0 : i64, tpu.core_type = #tpu.core_type<tc>, window_params = [{transform_indices = @transform_0, window_bounds = array<i64: 8, 5>}, {pipeline_mode = #tpu.pipeline_mode<synchronous>, transform_indices = @transform_1, window_bounds = array<i64: 5, 128>}, {pipeline_mode = #tpu.pipeline_mode<synchronous>, transform_indices = @transform_2, window_bounds = array<i64: 1, 128>}, {pipeline_mode = #tpu.pipeline_mode<synchronous>, transform_indices = @transform_3, window_bounds = array<i64: 128, 256>}, {pipeline_mode = #tpu.pipeline_mode<synchronous>, transform_indices = @transform_4, window_bounds = array<i64: 1, 256>}, {pipeline_mode = #tpu.pipeline_mode<synchronous>, transform_indices = @transform_5, window_bounds = array<i64: 256, 128>}, {pipeline_mode = #tpu.pipeline_mode<synchronous>, transform_indices = @transform_6, window_bounds = array<i64: 1, 128>}, {pipeline_mode = #tpu.pipeline_mode<synchronous>, transform_indices = @transform_7, window_bounds = array<i64: 128, 8>}, {pipeline_mode = #tpu.pipeline_mode<synchronous>, transform_indices = @transform_8, window_bounds = array<i64: 1, 8>}, {transform_indices = @transform_9, window_bounds = array<i64: 8, 8>}]} {
    %c0 = arith.constant 0 : index
    %c0_0 = arith.constant 0 : index
    %0 = vector.load %arg1[%c0, %c0_0] : memref<8x5xf32, #tpu.memory_space<vmem>>, vector<8x5xf32>
    %c0_1 = arith.constant 0 : index
    %c0_2 = arith.constant 0 : index
    %1 = vector.load %arg2[%c0_1, %c0_2] : memref<5x128xf32, #tpu.memory_space<vmem>>, vector<5x128xf32>
    %cst = arith.constant dense<0.000000e+00> : vector<8x128xf32>
    %2 = tpu.matmul %0, %1, %cst {dimension_numbers = #tpu.dot_dimension_numbers<[1], [0], [0], [1], [0, 0, 1, 1], [], []>} : vector<8x5xf32>, vector<5x128xf32>, vector<8x128xf32> -> vector<8x128xf32>
    %c0_3 = arith.constant 0 : index
    %c0_4 = arith.constant 0 : index
    %3 = vector.load %arg3[%c0_3, %c0_4] : memref<1x128xf32, #tpu.memory_space<vmem>>, vector<1x128xf32>
    %4 = vector.broadcast %3 : vector<1x128xf32> to vector<8x128xf32>
    %5 = arith.addf %2, %4 : vector<8x128xf32>
    %cst_5 = arith.constant 0.000000e+00 : f32
    %6 = vector.broadcast %cst_5 : f32 to vector<8x128xf32>
    %7 = arith.maximumf %5, %6 : vector<8x128xf32>
    %8 = arith.truncf %7 : vector<8x128xf32> to vector<8x128xbf16>
    %c0_6 = arith.constant 0 : index
    %c0_7 = arith.constant 0 : index
    %9 = vector.load %arg4[%c0_6, %c0_7] : memref<128x256xbf16, #tpu.memory_space<vmem>>, vector<128x256xbf16>
    %cst_8 = arith.constant dense<0.000000e+00> : vector<8x256xf32>
    %10 = tpu.matmul %8, %9, %cst_8 {dimension_numbers = #tpu.dot_dimension_numbers<[1], [0], [0], [1], [0, 0, 1, 1], [], []>} : vector<8x128xbf16>, vector<128x256xbf16>, vector<8x256xf32> -> vector<8x256xf32>
    %c0_9 = arith.constant 0 : index
    %c0_10 = arith.constant 0 : index
    %11 = vector.load %arg5[%c0_9, %c0_10] : memref<1x256xf32, #tpu.memory_space<vmem>>, vector<1x256xf32>
    %12 = vector.broadcast %11 : vector<1x256xf32> to vector<8x256xf32>
    %13 = arith.addf %10, %12 : vector<8x256xf32>
    %cst_11 = arith.constant 0.000000e+00 : f32
    %14 = vector.broadcast %cst_11 : f32 to vector<8x256xf32>
    %15 = arith.maximumf %13, %14 : vector<8x256xf32>
    %16 = arith.truncf %15 : vector<8x256xf32> to vector<8x256xbf16>
    %c0_12 = arith.constant 0 : index
    %c0_13 = arith.constant 0 : index
    %17 = vector.load %arg6[%c0_12, %c0_13] : memref<256x128xbf16, #tpu.memory_space<vmem>>, vector<256x128xbf16>
    %cst_14 = arith.constant dense<0.000000e+00> : vector<8x128xf32>
    %18 = tpu.matmul %16, %17, %cst_14 {dimension_numbers = #tpu.dot_dimension_numbers<[1], [0], [0], [1], [0, 0, 1, 1], [], []>} : vector<8x256xbf16>, vector<256x128xbf16>, vector<8x128xf32> -> vector<8x128xf32>
    %c0_15 = arith.constant 0 : index
    %c0_16 = arith.constant 0 : index
    %19 = vector.load %arg7[%c0_15, %c0_16] : memref<1x128xf32, #tpu.memory_space<vmem>>, vector<1x128xf32>
    %20 = vector.broadcast %19 : vector<1x128xf32> to vector<8x128xf32>
    %21 = arith.addf %18, %20 : vector<8x128xf32>
    %cst_17 = arith.constant 0.000000e+00 : f32
    %22 = vector.broadcast %cst_17 : f32 to vector<8x128xf32>
    %23 = arith.maximumf %21, %22 : vector<8x128xf32>
    %24 = arith.truncf %23 : vector<8x128xf32> to vector<8x128xbf16>
    %c0_18 = arith.constant 0 : index
    %c0_19 = arith.constant 0 : index
    %25 = vector.load %arg8[%c0_18, %c0_19] : memref<128x8xbf16, #tpu.memory_space<vmem>>, vector<128x8xbf16>
    %cst_20 = arith.constant dense<0.000000e+00> : vector<8x8xf32>
    %26 = tpu.matmul %24, %25, %cst_20 {dimension_numbers = #tpu.dot_dimension_numbers<[1], [0], [0], [1], [0, 0, 1, 1], [], []>} : vector<8x128xbf16>, vector<128x8xbf16>, vector<8x8xf32> -> vector<8x8xf32>
    %c0_21 = arith.constant 0 : index
    %c0_22 = arith.constant 0 : index
    %27 = vector.load %arg9[%c0_21, %c0_22] : memref<1x8xf32, #tpu.memory_space<vmem>>, vector<1x8xf32>
    %28 = vector.broadcast %27 : vector<1x8xf32> to vector<8x8xf32>
    %29 = arith.addf %26, %28 : vector<8x8xf32>
    %c0_23 = arith.constant 0 : index
    %c0_24 = arith.constant 0 : index
    %30 = vector.load %arg10[%c0_23, %c0_24] : memref<8x8xf32, #tpu.memory_space<vmem>>, vector<8x8xf32>
    tpu.vector_store %arg10[%c0_23, %c0_24], %29 {strides = array<i32>} : memref<8x8xf32, #tpu.memory_space<vmem>>, vector<8x8xf32>,
    return
  }
  func.func @transform_0(%arg0: i32) -> (i32, i32) {
    %c0_i32 = arith.constant 0 : i32
    %c0_i32_0 = arith.constant 0 : i32
    return %arg0, %c0_i32 : i32, i32
  }
  func.func @transform_1(%arg0: i32) -> (i32, i32) {
    %c0_i32 = arith.constant 0 : i32
    %c0_i32_0 = arith.constant 0 : i32
    %c0_i32_1 = arith.constant 0 : i32
    return %c0_i32, %c0_i32_0 : i32, i32
  }
  func.func @transform_2(%arg0: i32) -> (i32, i32) {
    %c0_i32 = arith.constant 0 : i32
    %c0_i32_0 = arith.constant 0 : i32
    %c0_i32_1 = arith.constant 0 : i32
    return %c0_i32, %c0_i32_0 : i32, i32
  }
  func.func @transform_3(%arg0: i32) -> (i32, i32) {
    %c0_i32 = arith.constant 0 : i32
    %c0_i32_0 = arith.constant 0 : i32
    %c0_i32_1 = arith.constant 0 : i32
    return %c0_i32, %c0_i32_0 : i32, i32
  }
  func.func @transform_4(%arg0: i32) -> (i32, i32) {
    %c0_i32 = arith.constant 0 : i32
    %c0_i32_0 = arith.constant 0 : i32
    %c0_i32_1 = arith.constant 0 : i32
    return %c0_i32, %c0_i32_0 : i32, i32
  }
  func.func @transform_5(%arg0: i32) -> (i32, i32) {
    %c0_i32 = arith.constant 0 : i32
    %c0_i32_0 = arith.constant 0 : i32
    %c0_i32_1 = arith.constant 0 : i32
    return %c0_i32, %c0_i32_0 : i32, i32
  }
  func.func @transform_6(%arg0: i32) -> (i32, i32) {
    %c0_i32 = arith.constant 0 : i32
    %c0_i32_0 = arith.constant 0 : i32
    %c0_i32_1 = arith.constant 0 : i32
    return %c0_i32, %c0_i32_0 : i32, i32
  }
  func.func @transform_7(%arg0: i32) -> (i32, i32) {
    %c0_i32 = arith.constant 0 : i32
    %c0_i32_0 = arith.constant 0 : i32
    %c0_i32_1 = arith.constant 0 : i32
    return %c0_i32, %c0_i32_0 : i32, i32
  }
  func.func @transform_8(%arg0: i32) -> (i32, i32) {
    %c0_i32 = arith.constant 0 : i32
    %c0_i32_0 = arith.constant 0 : i32
    %c0_i32_1 = arith.constant 0 : i32
    return %c0_i32, %c0_i32_0 : i32, i32
  }
  func.func @transform_9(%arg0: i32) -> (i32, i32) {
    %c0_i32 = arith.constant 0 : i32
    %c0_i32_0 = arith.constant 0 : i32
    return %arg0, %c0_i32 : i32, i32
  }
}

</mosaic_0001>

<bundles_post_ra>
// kernel: lenet_forward.1
= control target key start
LH: loop header
LB: loop body
LE: loop exit
PB: predicated region body
PF: predicated region fallthrough
CT: control target
= control target key end

     0   :  { %14 = vsyncpa [#allocation3], 0  ;;  %s948_s0 = inlined_call_operand.vmem [shape: f32[8,5], index: 0, kind: input, shape index: {}]   ;;  %s949_s1 = inlined_call_operand.vmem [shape: f32[5,128], index: 1, kind: input, shape index: {}]   ;;  %s950_s2 = inlined_call_operand.vmem [shape: f32[1,128], index: 2, kind: input, shape index: {}]   ;;  %s951_s3 = inlined_call_operand.hbm [shape: bf16[128,256], index: 3, kind: input, shape index: {}]   ;;  %s952_s4 = inlined_call_operand.vmem [shape: f32[1,256], index: 4, kind: input, shape index: {}]   ;;  %s953_s5 = inlined_call_operand.hbm [shape: bf16[256,128], index: 5, kind: input, shape index: {}]   ;;  %s954_s6 = inlined_call_operand.vmem [shape: f32[1,128], index: 6, kind: input, shape index: {}]   ;;  %s955_s7 = inlined_call_operand.vmem [shape: bf16[128,8], index: 7, kind: input, shape index: {}]   ;;  %s956_s8 = inlined_call_operand.vmem [shape: f32[1,8], index: 8, kind: input, shape index: {}]   ;;  %s957_s9 = inlined_call_operand.vmem [shape: f32[8,8], index: 9, kind: output, shape index: {}]  }
   0x1   :  { %15 = vsyncpa [#allocation5], 0  ;;  %s807_s30 = smov [#allocation2]   ;;  %s759_s13 = scalar_lea.hbm %s951_s3, 2048 }
   0x2   :  { %s27_s10 = sshll.u32 %s807_s30, 4  ;;  %p760_p0 = scmp.ne.s32.totalorder %s951_s3, %s759_s13  ;;  %s28_s10 = int_to_ptr.vmem [resolvable:$true] %s27_s10 }
   0x3   :  { %p763_p1 = scmp.lt.u32.totalorder %s759_s13, %s951_s3 }
   0x5   :  { %p765_p2 = pnand %p763_p1, %p760_p0 }
   0x7   :  { %768 = shalt.err (!%p765_p2)
}
   0x8   :  { %s769_s18 = scalar_lea.vmem %s28_s10, 2048  ;;  %p774_p4 = scmp.lt.s32.totalorder %s28_s10, %s28_s10 }
   0x9   :  { %p770_p3 = scmp.ne.s32.totalorder %s28_s10, %s769_s18  ;;  %p775_p5 = scmp.lt.s32.totalorder %s769_s18, %s769_s18 }
   0xb   :  { %p776_p6 = por %p775_p5, %p774_p4 }
   0xd   :  { %p777_p7 = pnand %p776_p6, %p770_p3 }
   0xf   :  { %780 = shalt.err (!%p777_p7)
}
  0x10   :  { %s808_s19 = smov 128   ;;  %s809_s20 = smov 8  }
  0x11   :  { %33 = dma.hbm_to_vmem [thread:$0]  %s951_s3, 2048, %s28_s10, [#allocation3], %s808_s19, %s808_s19, %s809_s20  }
  0x12   :  { %s810_s23 = smov [#allocation4]   ;;  %s781_s27 = scalar_lea.hbm %s953_s5, 2048 }
  0x13   :  { %s41_s24 = sshll.u32 %s810_s23, 4  ;;  %p782_p8 = scmp.ne.s32.totalorder %s953_s5, %s781_s27  ;;  %s42_s24 = int_to_ptr.vmem [resolvable:$true] %s41_s24 }
  0x14   :  { %p785_p9 = scmp.lt.u32.totalorder %s781_s27, %s953_s5 }
  0x16   :  { %p787_p10 = pnand %p785_p9, %p782_p8 }
  0x18   :  { %790 = shalt.err (!%p787_p10)
}
  0x19   :  { %s791_s12 = scalar_lea.vmem %s42_s24, 2048  ;;  %p796_p12 = scmp.lt.s32.totalorder %s42_s24, %s42_s24 }
  0x1a   :  { %p792_p11 = scmp.ne.s32.totalorder %s42_s24, %s791_s12  ;;  %p797_p13 = scmp.lt.s32.totalorder %s791_s12, %s791_s12 }
  0x1c   :  { %p798_p0 = por %p797_p13, %p796_p12 }
  0x1e   :  { %p799_p1 = pnand %p798_p0, %p792_p11 }
  0x20   :  { %802 = shalt.err (!%p799_p1)
}
  0x21   :  { %s811_s3 = smov 64   ;;  %s812_s10 = smov 4  }
  0x22   :  { %47 = dma.hbm_to_vmem [thread:$0]  %s953_s5, 2048, %s42_s24, [#allocation5], %s811_s3, %s811_s3, %s812_s10  }
  0x23   :  { %803 = dma.done.wait [#allocation3], 2048  }
  0x24   :  { %804 = vsyncadd [#allocation3], 4294965248 }
  0x25   :  { %805 = dma.done.wait [#allocation5], 2048  }
  0x26   :  { %806 = vsyncadd [#allocation5], 4294965248  ;;  %v813_v0 = vmov 0.0   ;;  %vm814_vm0 = vmmov 0   ;;  %vm74_vm1 = vcmask 1044480   ;;  %vm70_vm2 = vcmask 39936  }
  0x27   :  { %677 = vmatprep.subr.mxu0 %v813_v0  ;;  %679 = vmatprep.mubr.msk.f32.mxu0 %vm814_vm0, %v813_v0  ;;  %v62_v1 = vld [vmem:[%s949_s1] sm:$0x1f]  ;;  %v714_v5 = vld [vmem:[#allocation2 + $0x14] ss:$8 sps:$4 sm:$0xff]   ;;  %v716_v6 = vld [vmem:[#allocation2 + $0x10] ss:$8 sps:$4 sm:$0xff]   ;;  %v168_v48 = vlaneseq }
  0x28   :  { %v61_v2 = vld [vmem:[%s948_s0] sm:$0xff]  ;;  %678 = vmatpush3.msk.msra.mxu0 %vm74_vm1, %v62_v1  ;;  %v720_v9 = vld [vmem:[#allocation2 + $0x34] ss:$8 sps:$4 sm:$0xff]   ;;  %v722_v10 = vld [vmem:[#allocation2 + $0x30] ss:$8 sps:$4 sm:$0xff]   ;;  %v815_v19 = vmov 0  }
  0x29   :  { %v711_v3 = vld [vmem:[#allocation2 + $0x4] ss:$8 sps:$4 sm:$0xff]   ;;  %v713_v4 = vld [vmem:[#allocation2] ss:$8 sps:$4 sm:$0xff]   ;;  %680 = vmatmul.mubr.msk.f32.vlgmr.msra.gmra.mrb[0].mxu0 %vm70_vm2, %v61_v2  ;;  %v726_v13 = vld [vmem:[#allocation2 + $0x54] ss:$8 sps:$4 sm:$0xff]   ;;  %290 = vmatprep.mubr.bf16.mxu1 %v815_v19 }
  0x2a   :  { %258 = vmatprep.subr.bf16.mxu1 %v711_v3  ;;  %v717_v7 = vld [vmem:[#allocation2 + $0x24] ss:$8 sps:$4 sm:$0xff]   ;;  %v719_v8 = vld [vmem:[#allocation2 + $0x20] ss:$8 sps:$4 sm:$0xff]   ;;  %v728_v14 = vld [vmem:[#allocation2 + $0x50] ss:$8 sps:$4 sm:$0xff]  }
  0x2b   :  { %259 = vmatpush1.bf16.msra.mxu1 %v713_v4  ;;  %v723_v11 = vld [vmem:[#allocation2 + $0x44] ss:$8 sps:$4 sm:$0xff]   ;;  %v725_v12 = vld [vmem:[#allocation2 + $0x40] ss:$8 sps:$4 sm:$0xff]   ;;  %v732_v17 = vld [vmem:[#allocation2 + $0x74] ss:$8 sps:$4 sm:$0xff]  }
  0x2c   :  { %260 = vmatprep.subr.bf16.mxu1 %v714_v5  ;;  %v729_v15 = vld [vmem:[#allocation2 + $0x64] ss:$8 sps:$4 sm:$0xff]   ;;  %v731_v16 = vld [vmem:[#allocation2 + $0x60] ss:$8 sps:$4 sm:$0xff]   ;;  %v734_v18 = vld [vmem:[#allocation2 + $0x70] ss:$8 sps:$4 sm:$0xff]  }
  0x2d   :  { %v735_v20 = vld [vmem:[#allocation4 + $0x40] sm:$0xff]   ;;  %v737_v22 = vld [vmem:[#allocation4 + $0x48] sm:$0xff]   ;;  %v739_v24 = vld [vmem:[#allocation4 + $0x50] sm:$0xff]   ;;  %v169_v49 = vshrl.u32 %v168_v48, 7  ;;  %vm591_vm3 = vcmask 64512  }
  0x2e   :  { %v736_v21 = vld [vmem:[#allocation4] sm:$0xff]   ;;  %646 = vmatprep.subr.bf16.mxu0 %v735_v20  ;;  %v738_v23 = vld [vmem:[#allocation4 + $0x8] sm:$0xff]   ;;  %v740_v25 = vld [vmem:[#allocation4 + $0x10] sm:$0xff]  }
  0x2f   :  { %261 = vmatpush1.bf16.msra.mxu1 %v716_v6  ;;  %647 = vmatpush3.bf16.msra.mxu0 %v736_v21  ;;  %v741_v26 = vld [vmem:[#allocation4 + $0x58] sm:$0xff]   ;;  %v743_v28 = vld [vmem:[#allocation4 + $0x60] sm:$0xff]   ;;  %v745_v30 = vld [vmem:[#allocation4 + $0x68] sm:$0xff]   ;;  %v170_v50 = vsub.s32 0, %v169_v49  ;;  %v174_v52 = vsub.s32 1, %v169_v49 }
  0x30   :  { %262 = vmatprep.subr.bf16.mxu1 %v717_v7  ;;  %648 = vmatprep.subr.bf16.mxu0 %v737_v22  ;;  %v742_v27 = vld [vmem:[#allocation4 + $0x18] sm:$0xff]   ;;  %v744_v29 = vld [vmem:[#allocation4 + $0x20] sm:$0xff]   ;;  %v746_v31 = vld [vmem:[#allocation4 + $0x28] sm:$0xff]  }
  0x31   :  { %v599_v32 = vld [vmem:[%s950_s2] ss:$0 sm:$0xff]  ;;  %v747_v38 = vld [vmem:[#allocation4 + $0x70] sm:$0xff]   ;;  %v749_v40 = vld [vmem:[#allocation4 + $0x78] sm:$0xff]  }
  0x32   :  { %v748_v39 = vld [vmem:[#allocation4 + $0x30] sm:$0xff]   ;;  %v750_v41 = vld [vmem:[#allocation4 + $0x38] sm:$0xff]   ;;  %v751_v42 = vld [vmem:[%s955_s7] sm:$0xff]  }
  0x33   :  { %263 = vmatpush1.bf16.msra.mxu1 %v719_v8  ;;  %649 = vmatpush3.bf16.msra.mxu0 %v738_v23  ;;  %v752_v43 = vld [vmem:[%s955_s7 + $0x8] sm:$0xff]   ;;  %v753_v44 = vld [vmem:[%s955_s7 + $0x10] sm:$0xff]   ;;  %v754_v45 = vld [vmem:[%s955_s7 + $0x18] sm:$0xff]  }
  0x34   :  { %264 = vmatprep.subr.bf16.mxu1 %v720_v9  ;;  %650 = vmatprep.subr.bf16.mxu0 %v739_v24  ;;  %v755_v46 = vld [vmem:[%s955_s7 + $0x20] sm:$0xff]   ;;  %v756_v47 = vld [vmem:[%s955_s7 + $0x28] sm:$0xff]   ;;  %v757_v2 = vld [vmem:[%s955_s7 + $0x30] sm:$0xff]  }
  0x35   :  { %v166_v51 = vld [vmem:[%s952_s4] sm:$0x3]  ;;  %v758_v3 = vld [vmem:[%s955_s7 + $0x38] sm:$0xff]  }
  0x36   :  { %v171_v53 = vrot.slane %v166_v51, %v170_v50  ;;  %v175_v54 = vrot.slane %v166_v51, %v174_v52  ;;  %v618_v5 = vld [vmem:[%s954_s6] ss:$0 sm:$0xff] }
  0x37   :  { %265 = vmatpush1.bf16.msra.mxu1 %v722_v10  ;;  %651 = vmatpush3.bf16.msra.mxu0 %v740_v25 }
  0x38   :  { %266 = vmatprep.subr.bf16.mxu1 %v723_v11  ;;  %652 = vmatprep.subr.bf16.mxu0 %v741_v26 }
  0x3b   :  { %267 = vmatpush1.bf16.msra.mxu1 %v725_v12  ;;  %653 = vmatpush3.bf16.msra.mxu0 %v742_v27 }
  0x3c   :  { %268 = vmatprep.subr.bf16.mxu1 %v726_v13  ;;  %654 = vmatprep.subr.bf16.mxu0 %v743_v28 }
  0x3f   :  { %269 = vmatpush1.bf16.msra.mxu1 %v728_v14  ;;  %655 = vmatpush3.bf16.msra.mxu0 %v744_v29 }
  0x40   :  { %270 = vmatprep.subr.bf16.mxu1 %v729_v15  ;;  %656 = vmatprep.subr.bf16.mxu0 %v745_v30 }
  0x43   :  { %271 = vmatpush1.bf16.msra.mxu1 %v731_v16  ;;  %657 = vmatpush3.bf16.msra.mxu0 %v746_v31 }
  0x44   :  { %272 = vmatprep.subr.bf16.mxu1 %v732_v17  ;;  %658 = vmatprep.subr.bf16.mxu0 %v747_v38 }
  0x47   :  { %273 = vmatpush1.bf16.msra.mxu1 %v734_v18  ;;  %659 = vmatpush3.bf16.msra.mxu0 %v748_v39 }
  0x48   :  { %682 = vmatprep.subr.bf16.mxu1 %v813_v0  ;;  %660 = vmatprep.subr.bf16.mxu0 %v749_v40 }
  0x4b   :  { %661 = vmatpush3.bf16.msra.mxu0 %v750_v41 }
  0xfc   :  { %v144_v33 = vpop.f32.mrb[0].mxu0 }
  0xfd   :  { %v145_v34 = vadd.f32 %v599_v32, %v144_v33  ;;  %v681_v35 = vpop.f32.mrb[1].mxu0 }
  0xff   :  { %v148_v36 = vmax.f32 %v145_v34, 0.0 }
 0x101   :  { %v149_v37 = vpack.c.bf16 %v148_v36, %v148_v36 }
 0x103   :  { %291 = vmatmul.mubr.bf16.vlgmr.msra.gmra.mrb[0].mxu1 %v149_v37 }
 0x104   :  { %698 = vmatprep.mubr.msk.bf16.mxu1 %vm814_vm0, %v813_v0  ;;  %683 = vmatpush3.bf16.msra.mxu1 %v751_v42 }
 0x105   :  { %684 = vmatprep.subr.bf16.mxu1 %v813_v0 }
 0x108   :  { %685 = vmatpush3.bf16.msra.mxu1 %v752_v43 }
 0x109   :  { %686 = vmatprep.subr.bf16.mxu1 %v813_v0 }
 0x10c   :  { %687 = vmatpush3.bf16.msra.mxu1 %v753_v44 }
 0x10d   :  { %688 = vmatprep.subr.bf16.mxu1 %v813_v0 }
 0x110   :  { %689 = vmatpush3.bf16.msra.mxu1 %v754_v45 }
 0x111   :  { %690 = vmatprep.subr.bf16.mxu1 %v813_v0 }
 0x114   :  { %691 = vmatpush3.bf16.msra.mxu1 %v755_v46 }
 0x115   :  { %692 = vmatprep.subr.bf16.mxu1 %v813_v0 }
 0x118   :  { %693 = vmatpush3.bf16.msra.mxu1 %v756_v47 }
 0x119   :  { %694 = vmatprep.subr.bf16.mxu1 %v813_v0 }
 0x11c   :  { %695 = vmatpush3.bf16.msra.mxu1 %v757_v2 }
 0x11d   :  { %696 = vmatprep.subr.bf16.mxu1 %v813_v0  ;;  %v635_v0 = vld [vmem:[%s956_s8] ss:$0 sm:$0xff] }
 0x120   :  { %697 = vmatpush3.bf16.msra.mxu1 %v758_v3 }
 0x1d6   :  { %v292_v55 = vpop.f32.mrb[0].mxu1 }
 0x1d7   :  { %v293_v56 = vadd.f32 %v292_v55, %v171_v53  ;;  %v294_v57 = vpop.f32.mrb[1].mxu1 }
 0x1d8   :  { %v295_v58 = vadd.f32 %v294_v57, %v175_v54  ;;  %v296_v59 = vpop.f32.mrb[2].mxu1 }
 0x1d9   :  { %v299_v60 = vmax.f32 %v293_v56, 0.0  ;;  %v297_v61 = vpop.f32.mrb[3].mxu1 }
 0x1da   :  { %v300_v62 = vmax.f32 %v295_v58, 0.0 }
 0x1db   :  { %v301_v1 = vpack.c.bf16 %v299_v60, %v299_v60 }
 0x1dc   :  { %v302_v63 = vpack.c.bf16 %v300_v62, %v300_v62 }
 0x1de   :  { %470 = vmatprep.mubr.bf16.mxu0 %v302_v63 }
 0x1df   :  { %471 = vmatmul.mubr.bf16.vlgmr.msra.gmra.mrb[4].mxu0 %v301_v1 }
 0x2b2   :  { %v662_v4 = vpop.f32.mrb[4].mxu0 }
 0x2b3   :  { %v663_v6 = vpop.f32.mrb[5].mxu0 }
 0x2b4   :  { %v664_v7 = vadd.f32 %v663_v6, %v662_v4  ;;  %v665_v8 = vpop.f32.mrb[6].mxu0 }
 0x2b5   :  { %v666_v9 = vpop.f32.mrb[7].mxu0 }
 0x2b6   :  { %v473_v10 = vadd.f32 %v664_v7, %v618_v5 }
 0x2b8   :  { %v478_v11 = vmax.f32 %v473_v10, 0.0 }
 0x2ba   :  { %v479_v12 = vpack.c.bf16 %v478_v11, %v478_v11 }
 0x2bc   :  { %699 = vmatmul.mubr.bf16.vlgmr.msra.gmra.mrb[4].mxu1 %v479_v12 }
 0x38f   :  { %v585_v13 = vpop.f32.mrb[4].mxu1 }
 0x390   :  { %v586_v14 = vadd.f32 %v635_v0, %v585_v13  ;;  %v700_v15 = vpop.f32.mrb[5].mxu1 }
 0x391   :  { %v588_v16 = vpop.f32.mrb[6].mxu1 }
 0x392   :  { %592 = vst.msk [vmem:[%s957_s9] sm:$0xff] %vm591_vm3, %v586_v14  ;;  %v701_v17 = vpop.f32.mrb[7].mxu1 }
 0x393   :  { %597 = vsyncpa [#allocation3], 1 }
 0x394   :  { %598 = vsyncpa [#allocation5], 1 }

</bundles_post_ra>
